<compile_context>
chip_gen: v6e
topology: v6e:2x2x1
jax: 0.10.0
libtpu: 0.0.40
codegen_flags: <defaults>
</compile_context>

<pallas_src>
import functools

import jax
import jax.numpy as jnp
from jax import lax
from jax.experimental import pallas as pl
from jax.experimental.pallas import tpu as pltpu

BN_EPS = 1e-5  # PyTorch BatchNorm1d default


# ---------------------------------------------------------------------------
# Stage 1: BatchNorm both inputs once per feature column tile, cast to bf16,
# and emit the f32 diagonal of C.
# ---------------------------------------------------------------------------
def _bn_prologue_kernel(x1_ref, x2_ref, z1_ref, z2_ref, diag_ref, *, batch):
    x1 = x1_ref[...].astype(jnp.float32)            # (B, tp)
    x2 = x2_ref[...].astype(jnp.float32)            # (B, tp)
    inv_b = 1.0 / batch

    # BatchNorm1d (training, affine=False): per-feature mean, biased variance.
    m1 = jnp.sum(x1, axis=0, keepdims=True) * inv_b             # (1, tp)
    xc1 = x1 - m1
    v1 = jnp.sum(xc1 * xc1, axis=0, keepdims=True) * inv_b
    z1 = xc1 * lax.rsqrt(v1 + BN_EPS)                           # (B, tp) f32

    m2 = jnp.sum(x2, axis=0, keepdims=True) * inv_b
    xc2 = x2 - m2
    v2 = jnp.sum(xc2 * xc2, axis=0, keepdims=True) * inv_b
    # Fold the final 1/B of C = z1.T @ z2 / B into z2's scale, once, here.
    z2 = xc2 * (lax.rsqrt(v2 + BN_EPS) * inv_b)                 # (B, tp) f32

    z1_ref[...] = z1.astype(jnp.bfloat16)
    z2_ref[...] = z2.astype(jnp.bfloat16)
    # f32 diagonal of C for these features: d_k = sum_b z1[b,k] * z2[b,k]
    # (1/B already folded into z2).  Keeps all diagonal handling out of the
    # nd^2 hot loop.  (Tiny O(lambd * bf16-error) bias remains vs. the bf16
    # MXU diagonal inside sum(C^2); negligible at lambd=0.005.)
    diag_ref[...] = jnp.sum(z1 * z2, axis=0, keepdims=True)     # (1, tp)


# ---------------------------------------------------------------------------
# Stage 2: one (tm, tn) tile of C per grid cell -> scalar partial
#   partial = lambd * sum(tile^2)
# ---------------------------------------------------------------------------
def _cross_corr_kernel(z1_ref, z2_ref, out_ref, *, lambd):
    # z1_ref: (B, tm) bf16, z2_ref: (B, tn) bf16 (1/B folded into z2).
    # K-major (contracting dim 0) bf16 MXU matmul with f32 accumulation.
    # TODO(synk): verify via pl.lower_as_mlir that Mosaic lowers this without
    # an XLU transpose of the (B, tm) operand; if it does, emit z1 already
    # transposed from the prologue instead.
    c = lax.dot_general(
        z1_ref[...], z2_ref[...],
        dimension_numbers=(((0,), (0,)), ((), ())),
        preferred_element_type=jnp.float32,
    )                                                           # (tm, tn)
    partial = lambd * jnp.sum(c * c)
    # Single lane-dense unmasked (8, 128) store; one scalar per grid cell.
    out_ref[...] = jnp.full(out_ref.shape, partial, dtype=jnp.float32)


# ---------------------------------------------------------------------------
# Tile / VMEM heuristics
# ---------------------------------------------------------------------------
def _vmem_cap_bytes():
    try:
        return int(pltpu.get_tpu_info().vmem_capacity_bytes)
    except Exception:
        return 64 << 20  # conservative: v7x per-TensorCore physical VMEM


def _divisor_tiles(d):
    opts = [t for t in (2048, 1024, 512, 256, 128) if d % t == 0]
    return opts if opts else [d]  # D not a multiple of 128 -> one full tile


def _pick_prologue_tile(batch, d, budget):
    # ~ (2 f32 inputs x 2 bufs x 4B) + (2 bf16 outputs x 2 bufs x 2B)
    #   + ~6 f32 (B, tp) intermediates  =>  ~48 * B * tp bytes per cell.
    opts = _divisor_tiles(d)
    for t in opts:
        if 48 * batch * t <= budget:
            return t
    return opts[-1]


def _pick_cross_tiles(batch, d, budget):
    # Column tile tn: >= 256 where possible (fills the 2x256 MXU N dim on
    # v6e/v7x) but modest so the row tile can grow.  Row tile tm: as large as
    # the VMEM budget allows -- it sets how many times z2 is re-streamed from
    # HBM (nd_rows passes of bf16 bytes).
    opts = _divisor_tiles(d)
    tn = next((t for t in opts if t <= 512), opts[-1])
    tm = opts[-1]
    for t in opts:
        # 2 bufs of bf16 inputs + ~2 f32 copies of the (tm, tn) C tile + slack.
        need = 4 * batch * (t + tn) + 8 * t * tn + (4 << 20)
        if need <= budget:
            tm = t
            break
    return tm, tn


def _clamp_vmem_limit(estimate, cap):
    hi = int(0.75 * cap)
    return int(min(max(estimate, 32 << 20), hi))


# ---------------------------------------------------------------------------
# Wrapper
# ---------------------------------------------------------------------------
def barlow_twins_loss(image_embeds, text_embeds, lambd=0.005,
                      tile_m=None, tile_n=None, prologue_tile=None):
    B, D = image_embeds.shape
    assert text_embeds.shape == (B, D)

    cap = _vmem_cap_bytes()
    tile_budget = max(24 << 20, int(0.6 * cap))  # bigger tiles on 128 MiB parts

    tp = _pick_prologue_tile(B, D, tile_budget) if prologue_tile is None else prologue_tile
    tm, tn = _pick_cross_tiles(B, D, tile_budget)
    if tile_m is not None:
        tm = tile_m
    if tile_n is not None:
        tn = tile_n
    assert D % tp == 0 and D % tm == 0 and D % tn == 0
    nd_p, nd_r, nd_c = D // tp, D // tm, D // tn

    # ---- Stage 1: BN + bf16 cast + diagonal of C ----
    pro_kernel = functools.partial(_bn_prologue_kernel, batch=B)
    pro_vmem = _clamp_vmem_limit(48 * B * tp + (4 << 20), cap)
    z1, z2, diag = pl.pallas_call(
        pro_kernel,
        out_shape=(
            jax.ShapeDtypeStruct((B, D), jnp.bfloat16),
            jax.ShapeDtypeStruct((B, D), jnp.bfloat16),
            jax.ShapeDtypeStruct((1, D), jnp.float32),
        ),
        grid=(nd_p,),
        in_specs=[
            pl.BlockSpec((B, tp), lambda i: (0, i)),
            pl.BlockSpec((B, tp), lambda i: (0, i)),
        ],
        out_specs=(
            pl.BlockSpec((B, tp), lambda i: (0, i)),
            pl.BlockSpec((B, tp), lambda i: (0, i)),
            pl.BlockSpec((1, tp), lambda i: (0, i)),
        ),
        compiler_params=pltpu.CompilerParams(
            dimension_semantics=("parallel",),
            vmem_limit_bytes=pro_vmem,
        ),
    )(image_embeds, text_embeds)

    # ---- Stage 2: lambd * sum(C^2), one scalar per (tm, tn) tile of C ----
    cc_kernel = functools.partial(_cross_corr_kernel, lambd=float(lambd))
    cc_vmem = _clamp_vmem_limit(4 * B * (tm + tn) + 8 * tm * tn + (8 << 20), cap)
    partials = pl.pallas_call(
        cc_kernel,
        out_shape=jax.ShapeDtypeStruct((8 * nd_r, 128 * nd_c), jnp.float32),
        grid=(nd_r, nd_c),
        in_specs=[
            pl.BlockSpec((B, tm), lambda i, j: (0, i)),
            pl.BlockSpec((B, tn), lambda i, j: (0, j)),
        ],
        out_specs=pl.BlockSpec((8, 128), lambda i, j: (i, j)),
        compiler_params=pltpu.CompilerParams(
            dimension_semantics=("parallel", "parallel"),
            vmem_limit_bytes=cc_vmem,
        ),
    )(z1, z2)

    # ---- Epilogue (plain JAX, tiny): combine partials + diagonal correction.
    #   loss = lambd * sum_all(C^2) + sum((d-1)^2) - lambd * sum(d^2)
    off_all = jnp.sum(partials[::8, ::128])
    d = diag[0]
    correction = jnp.sum((d - 1.0) ** 2) - lambd * jnp.sum(d * d)
    return off_all + correction


def barlow_twins_ref(image_embeds, text_embeds, lambd=0.005):
    # Pure-JAX f32 reference mirroring the PyTorch module.
    def bn(x):
        mean = jnp.mean(x, axis=0, keepdims=True)
        var = jnp.var(x, axis=0, keepdims=True)  # biased, like PyTorch BN
        return (x - mean) / jnp.sqrt(var + BN_EPS)

    B = image_embeds.shape[0]
    c = bn(image_embeds).T @ bn(text_embeds) / B
    on = jnp.sum((jnp.diagonal(c) - 1.0) ** 2)
    off = jnp.sum(c * c) - jnp.sum(jnp.diagonal(c) ** 2)
    return on + lambd * off


if __name__ == "__main__":
    # The module __init__ only fixes embedding_size (BatchNorm1d width, no
    # affine params) and lambd; inputs are the two embedding batches.
    lambd = 0.005
    key = jax.random.PRNGKey(0)

    # Test 1: toy shape, single-tile grids.
    batch, embedding_size = 8, 128
    k1, k2 = jax.random.split(key)
    image_embeds = jax.random.normal(k1, (batch, embedding_size), jnp.float32)
    text_embeds = jax.random.normal(k2, (batch, embedding_size), jnp.float32)
    loss = jax.block_until_ready(
        barlow_twins_loss(image_embeds, text_embeds, lambd=lambd))
    ref = barlow_twins_ref(image_embeds, text_embeds, lambd=lambd)
    # bf16 MXU operands with f32 accumulation -> ~1e-3-level agreement.
    assert jnp.allclose(loss, ref, rtol=1e-3, atol=1e-3), (loss, ref)

    # Test 2: exercises the tiled (2 x 2) cross-correlation grid, the
    # 2-step prologue grid, and both parallel axes.
    batch2, d2 = 16, 256
    k3, k4 = jax.random.split(k2)
    img2 = jax.random.normal(k3, (batch2, d2), jnp.float32)
    txt2 = jax.random.normal(k4, (batch2, d2), jnp.float32)
    loss2 = jax.block_until_ready(
        barlow_twins_loss(img2, txt2, lambd=lambd,
                          tile_m=128, tile_n=128, prologue_tile=128))
    ref2 = barlow_twins_ref(img2, txt2, lambd=lambd)
    assert jnp.allclose(loss2, ref2, rtol=1e-3, atol=1e-3), (loss2, ref2)

    print("KERNEL_OK")
</pallas_src>

<mosaic_0001>
module attributes {stable_mosaic.version = 11 : i64} {
  func.func @_bn_prologue_kernel(%arg0: i32, %arg1: memref<8x128xf32, #tpu.memory_space<vmem>>, %arg2: memref<8x128xf32, #tpu.memory_space<vmem>>, %arg3: memref<8x128xbf16, #tpu.memory_space<vmem>>, %arg4: memref<8x128xbf16, #tpu.memory_space<vmem>>, %arg5: memref<1x128xf32, #tpu.memory_space<vmem>>) attributes {dimension_semantics = [#tpu.dimension_semantics<parallel>], iteration_bounds = array<i64: 1>, scalar_prefetch = 0 : i64, scratch_operands = 0 : i64, tpu.core_type = #tpu.core_type<tc>, window_params = [{transform_indices = @transform_0, window_bounds = array<i64: 8, 128>}, {transform_indices = @transform_1, window_bounds = array<i64: 8, 128>}, {transform_indices = @transform_2, window_bounds = array<i64: 8, 128>}, {transform_indices = @transform_3, window_bounds = array<i64: 8, 128>}, {transform_indices = @transform_4, window_bounds = array<i64: 1, 128>}]} {
    %c0 = arith.constant 0 : index
    %c0_0 = arith.constant 0 : index
    %0 = vector.load %arg1[%c0, %c0_0] : memref<8x128xf32, #tpu.memory_space<vmem>>, vector<8x128xf32>
    %c0_1 = arith.constant 0 : index
    %c0_2 = arith.constant 0 : index
    %1 = vector.load %arg2[%c0_1, %c0_2] : memref<8x128xf32, #tpu.memory_space<vmem>>, vector<8x128xf32>
    %cst = arith.constant dense<0.000000e+00> : vector<128xf32>
    %2 = vector.multi_reduction <add>, %0, %cst [0] : vector<8x128xf32> to vector<128xf32>
    %3 = vector.shape_cast %2 : vector<128xf32> to vector<1x128xf32>
    %cst_3 = arith.constant 1.250000e-01 : f32
    %4 = vector.broadcast %cst_3 : f32 to vector<1x128xf32>
    %5 = arith.mulf %3, %4 : vector<1x128xf32>
    %6 = vector.broadcast %5 : vector<1x128xf32> to vector<8x128xf32>
    %7 = arith.subf %0, %6 : vector<8x128xf32>
    %8 = arith.mulf %7, %7 : vector<8x128xf32>
    %cst_4 = arith.constant dense<0.000000e+00> : vector<128xf32>
    %9 = vector.multi_reduction <add>, %8, %cst_4 [0] : vector<8x128xf32> to vector<128xf32>
    %10 = vector.shape_cast %9 : vector<128xf32> to vector<1x128xf32>
    %cst_5 = arith.constant 1.250000e-01 : f32
    %11 = vector.broadcast %cst_5 : f32 to vector<1x128xf32>
    %12 = arith.mulf %10, %11 : vector<1x128xf32>
    %cst_6 = arith.constant 9.99999974E-6 : f32
    %13 = vector.broadcast %cst_6 : f32 to vector<1x128xf32>
    %14 = arith.addf %12, %13 : vector<1x128xf32>
    %15 = math.rsqrt %14 : vector<1x128xf32>
    %16 = vector.broadcast %15 : vector<1x128xf32> to vector<8x128xf32>
    %17 = arith.mulf %7, %16 : vector<8x128xf32>
    %cst_7 = arith.constant dense<0.000000e+00> : vector<128xf32>
    %18 = vector.multi_reduction <add>, %1, %cst_7 [0] : vector<8x128xf32> to vector<128xf32>
    %19 = vector.shape_cast %18 : vector<128xf32> to vector<1x128xf32>
    %cst_8 = arith.constant 1.250000e-01 : f32
    %20 = vector.broadcast %cst_8 : f32 to vector<1x128xf32>
    %21 = arith.mulf %19, %20 : vector<1x128xf32>
    %22 = vector.broadcast %21 : vector<1x128xf32> to vector<8x128xf32>
    %23 = arith.subf %1, %22 : vector<8x128xf32>
    %24 = arith.mulf %23, %23 : vector<8x128xf32>
    %cst_9 = arith.constant dense<0.000000e+00> : vector<128xf32>
    %25 = vector.multi_reduction <add>, %24, %cst_9 [0] : vector<8x128xf32> to vector<128xf32>
    %26 = vector.shape_cast %25 : vector<128xf32> to vector<1x128xf32>
    %cst_10 = arith.constant 1.250000e-01 : f32
    %27 = vector.broadcast %cst_10 : f32 to vector<1x128xf32>
    %28 = arith.mulf %26, %27 : vector<1x128xf32>
    %cst_11 = arith.constant 9.99999974E-6 : f32
    %29 = vector.broadcast %cst_11 : f32 to vector<1x128xf32>
    %30 = arith.addf %28, %29 : vector<1x128xf32>
    %31 = math.rsqrt %30 : vector<1x128xf32>
    %cst_12 = arith.constant 1.250000e-01 : f32
    %32 = vector.broadcast %cst_12 : f32 to vector<1x128xf32>
    %33 = arith.mulf %31, %32 : vector<1x128xf32>
    %34 = vector.broadcast %33 : vector<1x128xf32> to vector<8x128xf32>
    %35 = arith.mulf %23, %34 : vector<8x128xf32>
    %36 = arith.truncf %17 : vector<8x128xf32> to vector<8x128xbf16>
    %c0_13 = arith.constant 0 : index
    %c0_14 = arith.constant 0 : index
    %37 = vector.load %arg3[%c0_13, %c0_14] : memref<8x128xbf16, #tpu.memory_space<vmem>>, vector<8x128xbf16>
    tpu.vector_store %arg3[%c0_13, %c0_14], %36 {strides = array<i32>} : memref<8x128xbf16, #tpu.memory_space<vmem>>, vector<8x128xbf16>,
    %38 = arith.truncf %35 : vector<8x128xf32> to vector<8x128xbf16>
    %c0_15 = arith.constant 0 : index
    %c0_16 = arith.constant 0 : index
    %39 = vector.load %arg4[%c0_15, %c0_16] : memref<8x128xbf16, #tpu.memory_space<vmem>>, vector<8x128xbf16>
    tpu.vector_store %arg4[%c0_15, %c0_16], %38 {strides = array<i32>} : memref<8x128xbf16, #tpu.memory_space<vmem>>, vector<8x128xbf16>,
    %40 = arith.mulf %17, %35 : vector<8x128xf32>
    %cst_17 = arith.constant dense<0.000000e+00> : vector<128xf32>
    %41 = vector.multi_reduction <add>, %40, %cst_17 [0] : vector<8x128xf32> to vector<128xf32>
    %42 = vector.shape_cast %41 : vector<128xf32> to vector<1x128xf32>
    %c0_18 = arith.constant 0 : index
    %c0_19 = arith.constant 0 : index
    %43 = vector.load %arg5[%c0_18, %c0_19] : memref<1x128xf32, #tpu.memory_space<vmem>>, vector<1x128xf32>
    tpu.vector_store %arg5[%c0_18, %c0_19], %42 {strides = array<i32>} : memref<1x128xf32, #tpu.memory_space<vmem>>, vector<1x128xf32>,
    return
  }
  func.func @transform_0(%arg0: i32) -> (i32, i32) {
    %c0_i32 = arith.constant 0 : i32
    %c0_i32_0 = arith.constant 0 : i32
    return %c0_i32, %arg0 : i32, i32
  }
  func.func @transform_1(%arg0: i32) -> (i32, i32) {
    %c0_i32 = arith.constant 0 : i32
    %c0_i32_0 = arith.constant 0 : i32
    return %c0_i32, %arg0 : i32, i32
  }
  func.func @transform_2(%arg0: i32) -> (i32, i32) {
    %c0_i32 = arith.constant 0 : i32
    %c0_i32_0 = arith.constant 0 : i32
    return %c0_i32, %arg0 : i32, i32
  }
  func.func @transform_3(%arg0: i32) -> (i32, i32) {
    %c0_i32 = arith.constant 0 : i32
    %c0_i32_0 = arith.constant 0 : i32
    return %c0_i32, %arg0 : i32, i32
  }
  func.func @transform_4(%arg0: i32) -> (i32, i32) {
    %c0_i32 = arith.constant 0 : i32
    %c0_i32_0 = arith.constant 0 : i32
    return %c0_i32, %arg0 : i32, i32
  }
}

</mosaic_0001>

<bundles_post_ra>
// kernel: tpu_custom_call.1
= control target key start
LH: loop header
LB: loop body
LE: loop exit
PB: predicated region body
PF: predicated region fallthrough
CT: control target
= control target key end

     0   :  { %10 = vsyncpa [#allocation3], 0  ;;  %s298_s0 = inlined_call_operand.hbm [shape: f32[8,128], index: 0, kind: input, shape index: {}]   ;;  %s299_s1 = inlined_call_operand.hbm [shape: f32[8,128], index: 1, kind: input, shape index: {}]   ;;  %s300_s2 = inlined_call_operand.hbm [shape: bf16[8,128], index: 2, kind: output, shape index: {0}]   ;;  %s301_s3 = inlined_call_operand.hbm [shape: bf16[8,128], index: 3, kind: output, shape index: {1}]   ;;  %s302_s4 = inlined_call_operand.hbm [shape: f32[1,128], index: 4, kind: output, shape index: {2}]  }
   0x1   :  { %11 = vsyncpa [#allocation6], 0 }
   0x2   :  { %12 = vsyncpa [#allocation4], 0 }
   0x3   :  { %13 = vsyncpa [#allocation9], 0  ;;  %s253_s15 = smov [#allocation2]   ;;  %s254_s17 = smov [#allocation5]  }
   0x4   :  { %s20_s16 = sshll.u32 %s253_s15, 4  ;;  %s30_s18 = sshll.u32 %s254_s17, 4  ;;  %s21_s16 = int_to_ptr.vmem [resolvable:$true] %s20_s16  ;;  %s31_s18 = int_to_ptr.vmem [resolvable:$true] %s30_s18 }
   0x5   :  { %s153_s19 = scalar_lea.vmem %s21_s16, 128  ;;  %p158_p1 = scmp.lt.s32.totalorder %s21_s16, %s21_s16 }
   0x6   :  { %p154_p0 = scmp.ne.s32.totalorder %s21_s16, %s153_s19  ;;  %p159_p2 = scmp.lt.s32.totalorder %s153_s19, %s153_s19 }
   0x8   :  { %p160_p3 = por %p159_p2, %p158_p1 }
   0xa   :  { %p161_p4 = pnand %p160_p3, %p154_p0 }
   0xc   :  { %164 = shalt.err (!%p161_p4)
}
   0xd   :  { %23 = dma.hbm_to_vmem [thread:$0]  %s298_s0, 128, %s21_s16, [#allocation3]  }
   0xe   :  { %s173_s22 = scalar_lea.vmem %s31_s18, 128  ;;  %p178_p6 = scmp.lt.s32.totalorder %s31_s18, %s31_s18 }
   0xf   :  { %p174_p5 = scmp.ne.s32.totalorder %s31_s18, %s173_s22  ;;  %p179_p7 = scmp.lt.s32.totalorder %s173_s22, %s173_s22 }
  0x11   :  { %p180_p8 = por %p179_p7, %p178_p6 }
  0x13   :  { %p181_p9 = pnand %p180_p8, %p174_p5 }
  0x15   :  { %184 = shalt.err (!%p181_p9)
}
  0x16   :  { %33 = dma.hbm_to_vmem [thread:$0]  %s299_s1, 128, %s31_s18, [#allocation6]  }
  0x17   :  { %245 = dma.done.wait [#allocation3], 128  }
  0x18   :  { %246 = vsyncadd [#allocation3], 4294967168 }
  0x19   :  { %247 = dma.done.wait [#allocation6], 128  }
  0x1a   :  { %248 = vsyncadd [#allocation6], 4294967168  ;;  %v41_v0 = vld [vmem:[#allocation5] sm:$0xff]  ;;  %v40_v1 = vld [vmem:[#allocation2] sm:$0xff]  ;;  %s255_s0 = smov [#allocation7]   ;;  %s256_s25 = smov [#allocation8]  }
  0x1b   :  { %v61_v2 = vrot.slane %v41_v0, 4  ;;  %v42_v3 = vrot.slane %v40_v1, 4  ;;  %s99_s1 = sshll.u32 %s255_s0, 4  ;;  %s109_s26 = sshll.u32 %s256_s25, 4  ;;  %s100_s1 = int_to_ptr.vmem [resolvable:$true] %s99_s1  ;;  %s110_s26 = int_to_ptr.vmem [resolvable:$true] %s109_s26 }
  0x1c   :  { %s185_s27 = scalar_lea.vmem %s100_s1, 64  ;;  %p190_p11 = scmp.lt.s32.totalorder %s100_s1, %s100_s1 }
  0x1d   :  { %v62_v4 = vadd.f32 %v61_v2, %v41_v0  ;;  %v43_v5 = vadd.f32 %v42_v3, %v40_v1  ;;  %p186_p10 = scmp.ne.s32.totalorder %s100_s1, %s185_s27  ;;  %p191_p12 = scmp.lt.s32.totalorder %s185_s27, %s185_s27 }
  0x1f   :  { %v63_v6 = vrot.slane %v62_v4, 2  ;;  %v44_v7 = vrot.slane %v43_v5, 2  ;;  %p192_p13 = por %p191_p12, %p190_p11 }
  0x21   :  { %v64_v8 = vadd.f32 %v63_v6, %v62_v4  ;;  %v45_v9 = vadd.f32 %v44_v7, %v43_v5  ;;  %p193_p0 = pnand %p192_p13, %p186_p10 }
  0x23   :  { %v65_v10 = vrot.slane %v64_v8, 1  ;;  %v46_v11 = vrot.slane %v45_v9, 1 }
  0x25   :  { %v66_v12 = vadd.f32 %v65_v10, %v64_v8  ;;  %v47_v13 = vadd.f32 %v46_v11, %v45_v9 }
  0x27   :  { %v67_v14 = vmul.f32 0.125, %v66_v12  ;;  %v48_v15 = vmul.f32 0.125, %v47_v13 }
  0x29   :  { %v68_v16 = vsub.f32 %v41_v0, %v67_v14  ;;  %v49_v17 = vsub.f32 %v40_v1, %v48_v15 }
  0x2b   :  { %v69_v18 = vmul.f32 %v68_v16, %v68_v16  ;;  %v50_v19 = vmul.f32 %v49_v17, %v49_v17 }
  0x2d   :  { %v70_v20 = vrot.slane %v69_v18, 4  ;;  %v51_v21 = vrot.slane %v50_v19, 4 }
  0x2f   :  { %v71_v22 = vadd.f32 %v70_v20, %v69_v18  ;;  %v52_v23 = vadd.f32 %v51_v21, %v50_v19 }
  0x31   :  { %v72_v24 = vrot.slane %v71_v22, 2  ;;  %v53_v25 = vrot.slane %v52_v23, 2 }
  0x33   :  { %v73_v26 = vadd.f32 %v72_v24, %v71_v22  ;;  %v54_v27 = vadd.f32 %v53_v25, %v52_v23 }
  0x35   :  { %v74_v28 = vrot.slane %v73_v26, 1  ;;  %v55_v29 = vrot.slane %v54_v27, 1 }
  0x37   :  { %v75_v30 = vadd.f32 %v74_v28, %v73_v26  ;;  %v56_v31 = vadd.f32 %v55_v29, %v54_v27 }
  0x39   :  { %v76_v32 = vmul.f32 0.125, %v75_v30  ;;  %v57_v33 = vmul.f32 0.125, %v56_v31 }
  0x3b   :  { %v77_v34 = vadd.f32 1e-05, %v76_v32  ;;  %v58_v35 = vadd.f32 1e-05, %v57_v33 }
  0x3d   :  { %141 = vrsqrt.f32 %v77_v34 }
  0x3e   :  { %143 = vrsqrt.f32 %v58_v35 }
  0x4a   :  { %v142_v36 = vpop.eup %141 }
  0x4b   :  { %v144_v37 = vpop.eup %143  ;;  %v79_v38 = vmul.f32 0.125, %v142_v36 }
  0x4c   :  { %v60_v39 = vmul.f32 %v144_v37, %v49_v17 }
  0x4d   :  { %v80_v40 = vmul.f32 %v79_v38, %v68_v16 }
  0x4e   :  { %v81_v41 = vpack.c.bf16 %v60_v39, %v60_v39 }
  0x4f   :  { %v83_v42 = vpack.c.bf16 %v80_v40, %v80_v40  ;;  %v85_v43 = vmul.f32 %v80_v40, %v60_v39 }
  0x50   :  { %82 = vst [vmem:[#allocation7] sm:$0xf] %v81_v41 }
  0x51   :  { %84 = vst [vmem:[#allocation8] sm:$0xf] %v83_v42  ;;  %v86_v44 = vrot.slane %v85_v43, 4 }
  0x52   :  { %196 = shalt.err (!%p193_p0)
}
  0x53   :  { %102 = dma.vmem_to_hbm [thread:$0]  %s100_s1, 64, %s300_s2, [#allocation4]  }
  0x54   :  { %s205_s30 = scalar_lea.vmem %s110_s26, 64  ;;  %p210_p2 = scmp.lt.s32.totalorder %s110_s26, %s110_s26 }
  0x55   :  { %p206_p1 = scmp.ne.s32.totalorder %s110_s26, %s205_s30  ;;  %p211_p3 = scmp.lt.s32.totalorder %s205_s30, %s205_s30 }
  0x57   :  { %p212_p4 = por %p211_p3, %p210_p2 }
  0x59   :  { %p213_p5 = pnand %p212_p4, %p206_p1 }
  0x5b   :  { %216 = shalt.err (!%p213_p5)
}
  0x5c   :  { %112 = dma.vmem_to_hbm [thread:$0]  %s110_s26, 64, %s301_s3, [#allocation9]   ;;  %v87_v45 = vadd.f32 %v86_v44, %v85_v43 }
  0x5d   :  { %s257_s7 = smov [#allocation10]  }
  0x5e   :  { %v88_v46 = vrot.slane %v87_v45, 2  ;;  %s119_s8 = sshll.u32 %s257_s7, 4  ;;  %s120_s8 = int_to_ptr.vmem [resolvable:$true] %s119_s8 }
  0x5f   :  { %s225_s2 = scalar_lea.vmem %s120_s8, 16  ;;  %s229_s9 = scalar_lea.vmem %s120_s8, 32 }
  0x60   :  { %v89_v47 = vadd.f32 %v88_v46, %v87_v45  ;;  %p226_p6 = scmp.ne.s32.totalorder %s120_s8, %s225_s2  ;;  %p230_p7 = scmp.lt.s32.totalorder %s120_s8, %s120_s8 }
  0x61   :  { %p231_p8 = scmp.lt.s32.totalorder %s229_s9, %s225_s2 }
  0x62   :  { %v90_v48 = vrot.slane %v89_v47, 1 }
  0x63   :  { %p232_p9 = por %p231_p8, %p230_p7 }
  0x64   :  { %v91_v49 = vadd.f32 %v90_v48, %v89_v47 }
  0x65   :  { %p233_p10 = pnand %p232_p9, %p226_p6 }
  0x66   :  { %92 = vst [vmem:[#allocation10] sm:$0x1] %v91_v49 }
  0x67   :  { %236 = shalt.err (!%p233_p10)
}
  0x68   :  { %122 = dma.vmem_to_hbm [thread:$0]  %s120_s8, 16, %s302_s4, [#allocation9]  }
  0x69   :  { %249 = dma.done.wait [#allocation4], 64  }
  0x6a   :  { %250 = vsyncadd [#allocation4], 4294967232 }
  0x6b   :  { %251 = dma.done.wait [#allocation9], 80  }
  0x6c   :  { %252 = vsyncadd [#allocation9], 4294967216 }
  0x6d   :  { %132 = vsyncpa [#allocation3], 1 }
  0x6e   :  { %133 = vsyncpa [#allocation6], 1 }
  0x6f   :  { %134 = vsyncpa [#allocation4], 1 }
  0x70   :  { %135 = vsyncpa [#allocation9], 1 }

</bundles_post_ra>
